<compile_context>
chip_gen: v7x
topology: tpu7x:2x2x1
jax: 0.10.0
libtpu: 0.0.40
codegen_flags: <defaults>
</compile_context>

<pallas_src>
from functools import partial

import jax
import jax.numpy as jnp
from jax.experimental import pallas as pl
from jax.experimental.pallas import tpu as pltpu


# ---------------------------------------------------------------------------
# Fused kernel: whole residual block for one batch image.
#   x2_ref, x1_ref, o_ref : (P, H*W)   channel-padded, lane-dense activations
#   w_ref                 : (3, P, 10*P) packed im2col weights (+bias column)
# ---------------------------------------------------------------------------
def _res_block_kernel(x2_ref, x1_ref, w_ref, o_ref, *, H, W):
    P, HW = x2_ref.shape

    # Boundary masks: materialized once, reused by all three convs.
    lane = jax.lax.broadcasted_iota(jnp.int32, (P, HW), 1)
    col = lane % W
    first_col = col == 0
    last_col = col == W - 1
    first_row = lane < W          # row 0  <=> lane index < W
    last_row = lane >= HW - W     # row H-1 <=> lane index >= HW - W

    # Bias rows of the im2col stack (weight column 9P holds the bias).
    ones_blk = jnp.ones((P, HW), jnp.float32)

    def conv3x3(a, w_aug, relu):
        # Column taps dj in {-1,0,+1}; 'reflect' pad: col -1 -> 1, col W -> W-2.
        col_m_raw = pltpu.roll(a, 1, axis=1)        # value at column j-1 (wraps at j=0)
        col_p_raw = pltpu.roll(a, HW - 1, axis=1)   # value at column j+1 (wraps at j=W-1)
        cols = (jnp.where(first_col, col_p_raw, col_m_raw),   # dj = -1
                a,                                            # dj =  0
                jnp.where(last_col, col_m_raw, col_p_raw))    # dj = +1

        # Row taps di in {-1,0,+1}; 'reflect' pad: row -1 -> 1, row H -> H-2.
        taps = [[None] * 3 for _ in range(3)]
        for kj, c in enumerate(cols):
            row_m_raw = pltpu.roll(c, W, axis=1)        # value at row i-1 (wraps at i=0)
            row_p_raw = pltpu.roll(c, HW - W, axis=1)   # value at row i+1 (wraps at i=H-1)
            taps[0][kj] = jnp.where(first_row, row_p_raw, row_m_raw)   # di = -1
            taps[1][kj] = c                                            # di =  0
            taps[2][kj] = jnp.where(last_row, row_m_raw, row_p_raw)    # di = +1

        # im2col stack: (10P, HW); every piece is a tile-aligned (P, HW) slab.
        stack = jnp.concatenate(
            [taps[ki][kj] for ki in range(3) for kj in range(3)] + [ones_blk],
            axis=0)
        acc = jnp.dot(w_aug, stack, preferred_element_type=jnp.float32)  # (P, HW)
        return jnp.maximum(acc, 0.0) if relu else acc

    x2 = x2_ref[...].astype(jnp.float32)                  # (P, HW)
    h = conv3x3(x2, w_ref[0], relu=True)                  # C   -> C/4 (padded to P)
    h = conv3x3(h, w_ref[1], relu=True)                   # C/4 -> C/4 (padded to P)
    fx2 = conv3x3(h, w_ref[2], relu=False)                # C/4 -> C   (padded to P)
    o_ref[...] = (fx2 + x1_ref[...].astype(jnp.float32)).astype(o_ref.dtype)


# ---------------------------------------------------------------------------
# Wrapper
# ---------------------------------------------------------------------------
def _round_up(v, m):
    return (v + m - 1) // m * m


def _prep_conv_params(w, b, P):
    """HWIO (3,3,cin,cout) weights + (cout,) bias -> (P, 10P) im2col matrix."""
    kh, kw, cin, cout = w.shape
    wp = jnp.zeros((kh, kw, P, P), jnp.float32).at[:, :, :cin, :cout].set(w)
    wmat = jnp.transpose(wp, (3, 0, 1, 2)).reshape(P, kh * kw * P)   # (P, 9P)
    bias_blk = jnp.zeros((P, P), jnp.float32).at[:cout, 0].set(b)    # (P, P)
    return jnp.concatenate([wmat, bias_blk], axis=1)                 # (P, 10P)


def residual_block_forward(x1, x2, params):
    """stride=1 forward: returns (x2, conv(x2) + x1).  Inputs/outputs NCHW."""
    (w1, b1), (w2, b2), (w3, b3) = params
    N, C, H, W = x2.shape
    HW = H * W
    P = _round_up(max(C, C // 4), 8)     # tile-aligned channel width

    wpack = jnp.stack([_prep_conv_params(w1, b1, P),
                       _prep_conv_params(w2, b2, P),
                       _prep_conv_params(w3, b3, P)], axis=0)        # (3, P, 10P)

    x2f = x2.reshape(N, C, HW)           # contiguous reshape only — no transpose
    x1f = x1.reshape(N, C, HW)
    if P != C:                            # pad channels to the aligned width
        pad = ((0, 0), (0, P - C), (0, 0))
        x2f = jnp.pad(x2f, pad)
        x1f = jnp.pad(x1f, pad)

    kernel = partial(_res_block_kernel, H=H, W=W)
    y1f = pl.pallas_call(
        kernel,
        out_shape=jax.ShapeDtypeStruct((N, P, HW), x2.dtype),
        grid_spec=pltpu.PrefetchScalarGridSpec(
            num_scalar_prefetch=0,
            grid=(N,),
            in_specs=[
                pl.BlockSpec((None, P, HW), lambda n: (n, 0, 0)),     # x2
                pl.BlockSpec((None, P, HW), lambda n: (n, 0, 0)),     # x1 (residual)
                pl.BlockSpec((3, P, 10 * P), lambda n: (0, 0, 0)),    # packed weights
            ],
            out_specs=pl.BlockSpec((None, P, HW), lambda n: (n, 0, 0)),
        ),
        compiler_params=pltpu.CompilerParams(
            dimension_semantics=("parallel",)),
    )(x2f, x1f, wpack)

    if P != C:
        y1f = y1f[:, :C, :]
    return x2, y1f.reshape(N, C, H, W)


# ---------------------------------------------------------------------------
# Pure-JAX reference (NCHW) for correctness check
# ---------------------------------------------------------------------------
def _conv_ref(x, w, b, relu=False):
    xp = jnp.pad(x, ((0, 0), (0, 0), (1, 1), (1, 1)), mode="reflect")
    H, W = x.shape[2], x.shape[3]
    acc = jnp.zeros((x.shape[0], w.shape[-1], H, W), jnp.float32)
    for ki in range(3):
        for kj in range(3):
            acc += jnp.einsum("nchw,cd->ndhw",
                              xp[:, :, ki:ki + H, kj:kj + W], w[ki, kj])
    acc += b[None, :, None, None]
    return jnp.maximum(acc, 0.0) if relu else acc


def _forward_ref(x1, x2, params):
    (w1, b1), (w2, b2), (w3, b3) = params
    h = _conv_ref(x2, w1, b1, relu=True)
    h = _conv_ref(h, w2, b2, relu=True)
    return _conv_ref(h, w3, b3) + x1


# ---------------------------------------------------------------------------
if __name__ == "__main__":
    # Module config: residual_block(channel=8, stride=1, mult=4, kernel=3)
    N, C, H, W = 2, 8, 16, 16
    CM = C // 4

    key = jax.random.PRNGKey(0)
    k_x1, k_x2, k_w1, k_w2, k_w3 = jax.random.split(key, 5)

    x1 = jax.random.normal(k_x1, (N, C, H, W), jnp.float32)
    x2 = jax.random.normal(k_x2, (N, C, H, W), jnp.float32)

    # Deterministic weights (HWIO); biases zeroed as in init_layers().
    w1 = 0.1 * jax.random.normal(k_w1, (3, 3, C, CM), jnp.float32)   # C   -> C/4
    w2 = 0.1 * jax.random.normal(k_w2, (3, 3, CM, CM), jnp.float32)  # C/4 -> C/4
    w3 = 0.1 * jax.random.normal(k_w3, (3, 3, CM, C), jnp.float32)   # C/4 -> C
    b1 = jnp.zeros((CM,), jnp.float32)
    b2 = jnp.zeros((CM,), jnp.float32)
    b3 = jnp.zeros((C,), jnp.float32)
    params = ((w1, b1), (w2, b2), (w3, b3))

    out_x2, y1 = residual_block_forward(x1, x2, params)
    jax.block_until_ready((out_x2, y1))

    y1_ref = _forward_ref(x1, x2, params)
    assert jnp.allclose(out_x2, x2)
    assert jnp.allclose(y1, y1_ref, atol=1e-4, rtol=1e-4)

    print("KERNEL_OK")
</pallas_src>

<mosaic_0001>
module attributes {stable_mosaic.version = 11 : i64} {
  func.func @_res_block_kernel(%arg0: i32, %arg1: memref<1x8x256xf32, #tpu.memory_space<vmem>>, %arg2: memref<1x8x256xf32, #tpu.memory_space<vmem>>, %arg3: memref<3x8x80xf32, #tpu.memory_space<vmem>>, %arg4: memref<1x8x256xf32, #tpu.memory_space<vmem>>) attributes {dimension_semantics = [#tpu.dimension_semantics<parallel>], iteration_bounds = array<i64: 2>, scalar_prefetch = 0 : i64, scratch_operands = 0 : i64, tpu.core_type = #tpu.core_type<tc>, window_params = [{transform_indices = @transform_0, window_bounds = array<i64: 1, 8, 256>}, {transform_indices = @transform_1, window_bounds = array<i64: 1, 8, 256>}, {pipeline_mode = #tpu.pipeline_mode<synchronous>, transform_indices = @transform_2, window_bounds = array<i64: 3, 8, 80>}, {transform_indices = @transform_3, window_bounds = array<i64: 1, 8, 256>}]} {
    %0 = tpu.iota {dimensions = array<i32: 1>} : vector<8x256xi32>
    %c16_i32 = arith.constant 16 : i32
    %c0_i32 = arith.constant 0 : i32
    %1 = arith.cmpi eq, %c16_i32, %c0_i32 : i32
    %c1_i32 = arith.constant 1 : i32
    %2 = arith.select %1, %c1_i32, %c16_i32 : i32
    %3 = vector.broadcast %2 : i32 to vector<8x256xi32>
    %4 = arith.remsi %0, %3 : vector<8x256xi32>
    %c0_i32_0 = arith.constant 0 : i32
    %5 = vector.broadcast %c0_i32_0 : i32 to vector<8x256xi32>
    %6 = arith.cmpi ne, %4, %5 : vector<8x256xi32>
    %c0_i32_1 = arith.constant 0 : i32
    %7 = vector.broadcast %c0_i32_1 : i32 to vector<8x256xi32>
    %8 = arith.cmpi slt, %4, %7 : vector<8x256xi32>
    %c0_i32_2 = arith.constant 0 : i32
    %9 = arith.cmpi slt, %2, %c0_i32_2 : i32
    %10 = vector.broadcast %9 : i1 to vector<8x256xi1>
    %11 = vector.broadcast %10 : vector<8x256xi1> to vector<8x256xi1>
    %12 = arith.xori %8, %11 : vector<8x256xi1>
    %13 = arith.andi %12, %6 : vector<8x256xi1>
    %14 = vector.broadcast %2 : i32 to vector<8x256xi32>
    %15 = arith.addi %4, %14 : vector<8x256xi32>
    %16 = arith.select %13, %15, %4 : vector<8x256xi1>, vector<8x256xi32>
    %c0_i32_3 = arith.constant 0 : i32
    %17 = vector.broadcast %c0_i32_3 : i32 to vector<8x256xi32>
    %18 = arith.cmpi eq, %16, %17 : vector<8x256xi32>
    %c15_i32 = arith.constant 15 : i32
    %19 = vector.broadcast %c15_i32 : i32 to vector<8x256xi32>
    %20 = arith.cmpi eq, %16, %19 : vector<8x256xi32>
    %c16_i32_4 = arith.constant 16 : i32
    %21 = vector.broadcast %c16_i32_4 : i32 to vector<8x256xi32>
    %22 = arith.cmpi slt, %0, %21 : vector<8x256xi32>
    %c240_i32 = arith.constant 240 : i32
    %23 = vector.broadcast %c240_i32 : i32 to vector<8x256xi32>
    %24 = arith.cmpi sge, %0, %23 : vector<8x256xi32>
    %cst = arith.constant 1.000000e+00 : f32
    %25 = vector.broadcast %cst : f32 to vector<8x256xf32>
    %c0 = arith.constant 0 : index
    %c0_5 = arith.constant 0 : index
    %c0_6 = arith.constant 0 : index
    %26 = vector.load %arg1[%c0, %c0_5, %c0_6] : memref<1x8x256xf32, #tpu.memory_space<vmem>>, vector<1x8x256xf32>
    %27 = vector.shape_cast %26 : vector<1x8x256xf32> to vector<8x256xf32>
    %c0_7 = arith.constant 0 : index
    %c0_8 = arith.constant 0 : index
    %c0_9 = arith.constant 0 : index
    %28 = vector.load %arg3[%c0_7, %c0_8, %c0_9] : memref<3x8x80xf32, #tpu.memory_space<vmem>>, vector<1x8x80xf32>
    %29 = vector.shape_cast %28 : vector<1x8x80xf32> to vector<8x80xf32>
    %c1_i32_10 = arith.constant 1 : i32
    %30 = tpu.dynamic_rotate %27 by %c1_i32_10 dim 1 : vector<8x256xf32>, i32 -> vector<8x256xf32>
    %c255_i32 = arith.constant 255 : i32
    %31 = tpu.dynamic_rotate %27 by %c255_i32 dim 1 : vector<8x256xf32>, i32 -> vector<8x256xf32>
    %32 = arith.select %18, %31, %30 : vector<8x256xi1>, vector<8x256xf32>
    %33 = arith.select %20, %30, %31 : vector<8x256xi1>, vector<8x256xf32>
    %c16_i32_11 = arith.constant 16 : i32
    %34 = tpu.dynamic_rotate %32 by %c16_i32_11 dim 1 : vector<8x256xf32>, i32 -> vector<8x256xf32>
    %c240_i32_12 = arith.constant 240 : i32
    %35 = tpu.dynamic_rotate %32 by %c240_i32_12 dim 1 : vector<8x256xf32>, i32 -> vector<8x256xf32>
    %36 = arith.select %22, %35, %34 : vector<8x256xi1>, vector<8x256xf32>
    %37 = arith.select %24, %34, %35 : vector<8x256xi1>, vector<8x256xf32>
    %c16_i32_13 = arith.constant 16 : i32
    %38 = tpu.dynamic_rotate %27 by %c16_i32_13 dim 1 : vector<8x256xf32>, i32 -> vector<8x256xf32>
    %c240_i32_14 = arith.constant 240 : i32
    %39 = tpu.dynamic_rotate %27 by %c240_i32_14 dim 1 : vector<8x256xf32>, i32 -> vector<8x256xf32>
    %40 = arith.select %22, %39, %38 : vector<8x256xi1>, vector<8x256xf32>
    %41 = arith.select %24, %38, %39 : vector<8x256xi1>, vector<8x256xf32>
    %c16_i32_15 = arith.constant 16 : i32
    %42 = tpu.dynamic_rotate %33 by %c16_i32_15 dim 1 : vector<8x256xf32>, i32 -> vector<8x256xf32>
    %c240_i32_16 = arith.constant 240 : i32
    %43 = tpu.dynamic_rotate %33 by %c240_i32_16 dim 1 : vector<8x256xf32>, i32 -> vector<8x256xf32>
    %44 = arith.select %22, %43, %42 : vector<8x256xi1>, vector<8x256xf32>
    %45 = arith.select %24, %42, %43 : vector<8x256xi1>, vector<8x256xf32>
    %46 = tpu.concatenate %36, %40, %44, %32, %27, %33, %37, %41, %45, %25 in 0 : vector<8x256xf32>, vector<8x256xf32>, vector<8x256xf32>, vector<8x256xf32>, vector<8x256xf32>, vector<8x256xf32>, vector<8x256xf32>, vector<8x256xf32>, vector<8x256xf32>, vector<8x256xf32> -> vector<80x256xf32>
    %cst_17 = arith.constant dense<0.000000e+00> : vector<8x256xf32>
    %47 = tpu.matmul %29, %46, %cst_17 {dimension_numbers = #tpu.dot_dimension_numbers<[1], [0], [0], [1], [0, 0, 1, 1], [], []>} : vector<8x80xf32>, vector<80x256xf32>, vector<8x256xf32> -> vector<8x256xf32>
    %cst_18 = arith.constant 0.000000e+00 : f32
    %48 = vector.broadcast %cst_18 : f32 to vector<8x256xf32>
    %49 = arith.maximumf %47, %48 : vector<8x256xf32>
    %c1 = arith.constant 1 : index
    %c0_19 = arith.constant 0 : index
    %c0_20 = arith.constant 0 : index
    %50 = vector.load %arg3[%c1, %c0_19, %c0_20] : memref<3x8x80xf32, #tpu.memory_space<vmem>>, vector<1x8x80xf32>
    %51 = vector.shape_cast %50 : vector<1x8x80xf32> to vector<8x80xf32>
    %c1_i32_21 = arith.constant 1 : i32
    %52 = tpu.dynamic_rotate %49 by %c1_i32_21 dim 1 : vector<8x256xf32>, i32 -> vector<8x256xf32>
    %c255_i32_22 = arith.constant 255 : i32
    %53 = tpu.dynamic_rotate %49 by %c255_i32_22 dim 1 : vector<8x256xf32>, i32 -> vector<8x256xf32>
    %54 = arith.select %18, %53, %52 : vector<8x256xi1>, vector<8x256xf32>
    %55 = arith.select %20, %52, %53 : vector<8x256xi1>, vector<8x256xf32>
    %c16_i32_23 = arith.constant 16 : i32
    %56 = tpu.dynamic_rotate %54 by %c16_i32_23 dim 1 : vector<8x256xf32>, i32 -> vector<8x256xf32>
    %c240_i32_24 = arith.constant 240 : i32
    %57 = tpu.dynamic_rotate %54 by %c240_i32_24 dim 1 : vector<8x256xf32>, i32 -> vector<8x256xf32>
    %58 = arith.select %22, %57, %56 : vector<8x256xi1>, vector<8x256xf32>
    %59 = arith.select %24, %56, %57 : vector<8x256xi1>, vector<8x256xf32>
    %c16_i32_25 = arith.constant 16 : i32
    %60 = tpu.dynamic_rotate %49 by %c16_i32_25 dim 1 : vector<8x256xf32>, i32 -> vector<8x256xf32>
    %c240_i32_26 = arith.constant 240 : i32
    %61 = tpu.dynamic_rotate %49 by %c240_i32_26 dim 1 : vector<8x256xf32>, i32 -> vector<8x256xf32>
    %62 = arith.select %22, %61, %60 : vector<8x256xi1>, vector<8x256xf32>
    %63 = arith.select %24, %60, %61 : vector<8x256xi1>, vector<8x256xf32>
    %c16_i32_27 = arith.constant 16 : i32
    %64 = tpu.dynamic_rotate %55 by %c16_i32_27 dim 1 : vector<8x256xf32>, i32 -> vector<8x256xf32>
    %c240_i32_28 = arith.constant 240 : i32
    %65 = tpu.dynamic_rotate %55 by %c240_i32_28 dim 1 : vector<8x256xf32>, i32 -> vector<8x256xf32>
    %66 = arith.select %22, %65, %64 : vector<8x256xi1>, vector<8x256xf32>
    %67 = arith.select %24, %64, %65 : vector<8x256xi1>, vector<8x256xf32>
    %68 = tpu.concatenate %58, %62, %66, %54, %49, %55, %59, %63, %67, %25 in 0 : vector<8x256xf32>, vector<8x256xf32>, vector<8x256xf32>, vector<8x256xf32>, vector<8x256xf32>, vector<8x256xf32>, vector<8x256xf32>, vector<8x256xf32>, vector<8x256xf32>, vector<8x256xf32> -> vector<80x256xf32>
    %cst_29 = arith.constant dense<0.000000e+00> : vector<8x256xf32>
    %69 = tpu.matmul %51, %68, %cst_29 {dimension_numbers = #tpu.dot_dimension_numbers<[1], [0], [0], [1], [0, 0, 1, 1], [], []>} : vector<8x80xf32>, vector<80x256xf32>, vector<8x256xf32> -> vector<8x256xf32>
    %cst_30 = arith.constant 0.000000e+00 : f32
    %70 = vector.broadcast %cst_30 : f32 to vector<8x256xf32>
    %71 = arith.maximumf %69, %70 : vector<8x256xf32>
    %c2 = arith.constant 2 : index
    %c0_31 = arith.constant 0 : index
    %c0_32 = arith.constant 0 : index
    %72 = vector.load %arg3[%c2, %c0_31, %c0_32] : memref<3x8x80xf32, #tpu.memory_space<vmem>>, vector<1x8x80xf32>
    %73 = vector.shape_cast %72 : vector<1x8x80xf32> to vector<8x80xf32>
    %c1_i32_33 = arith.constant 1 : i32
    %74 = tpu.dynamic_rotate %71 by %c1_i32_33 dim 1 : vector<8x256xf32>, i32 -> vector<8x256xf32>
    %c255_i32_34 = arith.constant 255 : i32
    %75 = tpu.dynamic_rotate %71 by %c255_i32_34 dim 1 : vector<8x256xf32>, i32 -> vector<8x256xf32>
    %76 = arith.select %18, %75, %74 : vector<8x256xi1>, vector<8x256xf32>
    %77 = arith.select %20, %74, %75 : vector<8x256xi1>, vector<8x256xf32>
    %c16_i32_35 = arith.constant 16 : i32
    %78 = tpu.dynamic_rotate %76 by %c16_i32_35 dim 1 : vector<8x256xf32>, i32 -> vector<8x256xf32>
    %c240_i32_36 = arith.constant 240 : i32
    %79 = tpu.dynamic_rotate %76 by %c240_i32_36 dim 1 : vector<8x256xf32>, i32 -> vector<8x256xf32>
    %80 = arith.select %22, %79, %78 : vector<8x256xi1>, vector<8x256xf32>
    %81 = arith.select %24, %78, %79 : vector<8x256xi1>, vector<8x256xf32>
    %c16_i32_37 = arith.constant 16 : i32
    %82 = tpu.dynamic_rotate %71 by %c16_i32_37 dim 1 : vector<8x256xf32>, i32 -> vector<8x256xf32>
    %c240_i32_38 = arith.constant 240 : i32
    %83 = tpu.dynamic_rotate %71 by %c240_i32_38 dim 1 : vector<8x256xf32>, i32 -> vector<8x256xf32>
    %84 = arith.select %22, %83, %82 : vector<8x256xi1>, vector<8x256xf32>
    %85 = arith.select %24, %82, %83 : vector<8x256xi1>, vector<8x256xf32>
    %c16_i32_39 = arith.constant 16 : i32
    %86 = tpu.dynamic_rotate %77 by %c16_i32_39 dim 1 : vector<8x256xf32>, i32 -> vector<8x256xf32>
    %c240_i32_40 = arith.constant 240 : i32
    %87 = tpu.dynamic_rotate %77 by %c240_i32_40 dim 1 : vector<8x256xf32>, i32 -> vector<8x256xf32>
    %88 = arith.select %22, %87, %86 : vector<8x256xi1>, vector<8x256xf32>
    %89 = arith.select %24, %86, %87 : vector<8x256xi1>, vector<8x256xf32>
    %90 = tpu.concatenate %80, %84, %88, %76, %71, %77, %81, %85, %89, %25 in 0 : vector<8x256xf32>, vector<8x256xf32>, vector<8x256xf32>, vector<8x256xf32>, vector<8x256xf32>, vector<8x256xf32>, vector<8x256xf32>, vector<8x256xf32>, vector<8x256xf32>, vector<8x256xf32> -> vector<80x256xf32>
    %cst_41 = arith.constant dense<0.000000e+00> : vector<8x256xf32>
    %91 = tpu.matmul %73, %90, %cst_41 {dimension_numbers = #tpu.dot_dimension_numbers<[1], [0], [0], [1], [0, 0, 1, 1], [], []>} : vector<8x80xf32>, vector<80x256xf32>, vector<8x256xf32> -> vector<8x256xf32>
    %c0_42 = arith.constant 0 : index
    %c0_43 = arith.constant 0 : index
    %c0_44 = arith.constant 0 : index
    %92 = vector.load %arg2[%c0_42, %c0_43, %c0_44] : memref<1x8x256xf32, #tpu.memory_space<vmem>>, vector<1x8x256xf32>
    %93 = vector.shape_cast %92 : vector<1x8x256xf32> to vector<8x256xf32>
    %94 = arith.addf %91, %93 : vector<8x256xf32>
    %c0_45 = arith.constant 0 : index
    %c0_46 = arith.constant 0 : index
    %c0_47 = arith.constant 0 : index
    %95 = vector.load %arg4[%c0_45, %c0_46, %c0_47] : memref<1x8x256xf32, #tpu.memory_space<vmem>>, vector<1x8x256xf32>
    %96 = vector.shape_cast %95 : vector<1x8x256xf32> to vector<8x256xf32>
    %97 = vector.shape_cast %94 : vector<8x256xf32> to vector<1x8x256xf32>
    tpu.vector_store %arg4[%c0_45, %c0_46, %c0_47], %97 {strides = array<i32>} : memref<1x8x256xf32, #tpu.memory_space<vmem>>, vector<1x8x256xf32>,
    return
  }
  func.func @transform_0(%arg0: i32) -> (i32, i32, i32) {
    %c0_i32 = arith.constant 0 : i32
    %c0_i32_0 = arith.constant 0 : i32
    %c0_i32_1 = arith.constant 0 : i32
    return %arg0, %c0_i32, %c0_i32_0 : i32, i32, i32
  }
  func.func @transform_1(%arg0: i32) -> (i32, i32, i32) {
    %c0_i32 = arith.constant 0 : i32
    %c0_i32_0 = arith.constant 0 : i32
    %c0_i32_1 = arith.constant 0 : i32
    return %arg0, %c0_i32, %c0_i32_0 : i32, i32, i32
  }
  func.func @transform_2(%arg0: i32) -> (i32, i32, i32) {
    %c0_i32 = arith.constant 0 : i32
    %c0_i32_0 = arith.constant 0 : i32
    %c0_i32_1 = arith.constant 0 : i32
    %c0_i32_2 = arith.constant 0 : i32
    return %c0_i32, %c0_i32_0, %c0_i32_1 : i32, i32, i32
  }
  func.func @transform_3(%arg0: i32) -> (i32, i32, i32) {
    %c0_i32 = arith.constant 0 : i32
    %c0_i32_0 = arith.constant 0 : i32
    %c0_i32_1 = arith.constant 0 : i32
    return %arg0, %c0_i32, %c0_i32_0 : i32, i32, i32
  }
}

</mosaic_0001>

<bundles_post_ra>
// kernel: tpu_custom_call.1
= control target key start
LH: loop header
LB: loop body
LE: loop exit
PB: predicated region body
PF: predicated region fallthrough
CT: control target
= control target key end

     0   :  { %8 = vsyncpa [#allocation3], 0  ;;  %s1795_s0 = inlined_call_operand.hbm [shape: f32[2,8,256], index: 0, kind: input, shape index: {}]   ;;  %s1796_s1 = inlined_call_operand.hbm [shape: f32[2,8,256], index: 1, kind: input, shape index: {}]   ;;  %s1797_s2 = inlined_call_operand.hbm [shape: f32[3,8,80], index: 2, kind: input, shape index: {}]   ;;  %s1798_s3 = inlined_call_operand.hbm [shape: f32[2,8,256], index: 3, kind: output, shape index: {}]  }
   0x1   :  { %10 = vsyncpa [#allocation3 + $0x1], 0 }
   0x2   :  { %11 = vsyncpa [#allocation6], 0 }
   0x3   :  { %13 = vsyncpa [#allocation6 + $0x1], 0 }
   0x4   :  { %14 = vsyncpa [#allocation4], 0 }
   0x5   :  { %16 = vsyncpa [#allocation4 + $0x1], 0  ;;  %s1296_s12 = smov 0   ;;  %s1298_s13 = smov 0  }
   0x6   :  { %s1300_s14 = smov 0   ;;  %s1302_s15 = smov 0  }
   0x7 LB: > { %s1317_s16 = sadd.s32 4294967295, %s1262_s15   ;;  %s824_s17 = sadd.s32 4294967294, %s1262_s15   ;;  %s1262_s15 = sphi %s1302_s15, %s1828_s15   ;;  %s1258_s14 = sphi %s1300_s14, %s1827_s14   ;;  %s1254_s13 = sphi %s1298_s13, %s1826_s13   ;;  %s1250_s12 = sphi %s1296_s12, %s1825_s12  }
   0x8   : > { %p42_p0 = scmp.ne.s32.totalorder %s1254_s13, %s1250_s12  ;;  %p1799_p1 = scmp.eq.s32.totalorder %s1317_s16, 0 }
   0x9   : > { %p119_p3 = scmp.eq.s32.totalorder %s824_s17, 1  ;;  %p825_p5 = scmp.ge.s32.totalorder %s1262_s15, 1 }
   0xa   : > { %p1326_p4 = por %p1799_p1, %p42_p0  ;;  %p126_p7 = scmp.lt.s32.totalorder %s1262_s15, 3 }
   0xb   : > { %p1331_p6 = por %p119_p3, %p42_p0  ;;  %s1264_s21 = smov [#allocation7]  }
   0xc   : > { %s1803_s18 = scalar_select %p1326_p4, 1, 0 }
   0xd   : > { %s1804_s19 = scalar_select %p1331_p6, 1, 0 }
   0xe   : > { %p1336_p8 = pnand %p825_p5, %p126_p7  ;;  %s138_s22 = sshll.u32 %s1264_s21, 4  ;;  %s1340_s22 = int_to_ptr.vmem [resolvable:$true] %s138_s22 }
   0xf   : > { %s1352_s24 = sadd.s32 1, %s1262_s15   ;;  %s29_s25 = sadd.s32 1, %s1258_s14 }
  0x10   : > { %s1805_s20 = scalar_select %p1336_p8, 1, 0 }
  0x11   : > { %p920_p9 = pneg %p1336_p8  ;;  %s26_s26 = ssub.s32 %s1262_s15, %s1352_s24 }
  0x12   : > { %s1100_s29 = scalar_lea.hbm %s1797_s2, 384 }
  0x13   : > { %p1347_p11 = pnand %p920_p9, %p1799_p1  ;;  %p1101_p12 = scmp.ne.s32.totalorder %s1797_s2, %s1100_s29 }
  0x14   : > { %p1107_p5 = scmp.lt.u32.totalorder %s1100_s29, %s1797_s2 }
  0x15   : > { %p1102_p13 = pneg %p1347_p11 }
  0x17   : > { %p1103_p0 = pnand %p1102_p13, %p1101_p12 }
  0x19   : > { %p1104_p3 = pneg %p1103_p0 }
  0x1b   : > { %p1109_p7 = pnand %p1107_p5, %p1104_p3 }
  0x1d   : > { %1112 = shalt.err (!%p1109_p7)
}
  0x1e   : > { %s1113_s7 = scalar_lea.vmem %s1340_s22, 384  ;;  %p1121_p2 = scmp.lt.s32.totalorder %s1340_s22, %s1340_s22 }
  0x1f   : > { %p1114_p9 = scmp.ne.s32.totalorder %s1340_s22, %s1113_s7  ;;  %p1122_p6 = scmp.lt.s32.totalorder %s1113_s7, %s1113_s7 }
  0x21   : > { %p1116_p10 = pnand %p1114_p9, %p1102_p13  ;;  %p1123_p4 = por %p1122_p6, %p1121_p2 }
  0x23   : > { %p1117_p1 = pneg %p1116_p10 }
  0x25   : > { %p1124_p8 = pnand %p1123_p4, %p1117_p1 }
  0x27   : > { %1127 = shalt.err (!%p1124_p8)
}
  0x28   : > { %s1265_s8 = smov 128   ;;  %s1266_s9 = smov 8  }
  0x29   : > { %923 = dma.hbm_to_vmem [thread:$0]  (!%p1347_p11), %s1797_s2, 384, %s1340_s22, [#allocation6], %s1265_s8, %s1265_s8, %s1266_s9  }
  0x2a   : > { %p27_p2 = scmp.eq.s32.totalorder %s26_s26, 0  ;;  %p36_p1 = scmp.ne.s32.totalorder %s1258_s14, %s1254_s13 }
  0x2b   : > { %p37_p4 = scmp.eq.s32.totalorder %s1262_s15, 0  ;;  %p936_p6 = scmp.lt.s32.totalorder %s1262_s15, 2 }
  0x2c   : > { %s1383_s17 = scalar_select %p27_p2, %s1258_s14, %s29_s25  }
  0x2d   : > { %p38_p8 = por %p37_p4, %p36_p1  ;;  %p1807_p10 = scmp.eq.s32.totalorder %s1317_s16, 1 }
  0x2e   : > { %s152_s27 = sand.u32 1, %s1258_s14   ;;  %s847_s28 = sshll.u32 %s1262_s15, 8 }
  0x2f   : > { %p1387_p12 = por %p1807_p10, %p36_p1  ;;  %s1393_s29 = sshll.u32 %s152_s27, 4 }
  0x30   : > { %s1398_s22 = scalar_lea.hbm %s1795_s0, %s847_s28  ;;  %s156_s25 = scalar_lea.vmem [#allocation2], %s1393_s29 }
  0x31   : > { %s1808_s21 = scalar_select %p1387_p12, 1, 0 }
  0x32   : > { %s164_s26 = sshll.u32 %s156_s25, 4  ;;  %p1401_p11 = pnand %p936_p6, %p38_p8  ;;  %s1405_s26 = int_to_ptr.vmem [resolvable:$true] %s164_s26 }
  0x33   : > { %s1410_s7 = scalar_lea.hbm %s1796_s1, %s847_s28  ;;  %s153_s8 = scalar_lea.sflag [#allocation3], %s152_s27 }
  0x34   : > { %s1128_s9 = scalar_lea.hbm %s1398_s22, 256  ;;  %p1130_p0 = pneg %p1401_p11 }
  0x35   : > { %p1129_p13 = scmp.ne.s32.totalorder %s1398_s22, %s1128_s9  ;;  %s1133_s23 = scalar_lea.hbm %s1795_s0, 512 }
  0x36   : > { %p1134_p7 = scmp.lt.u32.totalorder %s1398_s22, %s1795_s0  ;;  %p1135_p9 = scmp.lt.u32.totalorder %s1133_s23, %s1128_s9 }
  0x37   : > { %p1131_p3 = pnand %p1130_p0, %p1129_p13  ;;  %p1137_p1 = scmp.lt.u32.totalorder %s1128_s9, %s1398_s22 }
  0x38   : > { %p1136_p2 = por %p1135_p9, %p1134_p7 }
  0x39   : > { %p1132_p5 = pneg %p1131_p3 }
  0x3a   : > { %p1138_p4 = por %p1137_p1, %p1136_p2 }
  0x3c   : > { %p1139_p6 = pnand %p1138_p4, %p1132_p5 }
  0x3e   : > { %1142 = shalt.err (!%p1139_p6)
}
  0x3f   : > { %s1143_s27 = scalar_lea.vmem %s1405_s26, 256  ;;  %s1267_s28 = smov [#allocation2]  }
  0x40   : > { %p1144_p8 = scmp.ne.s32.totalorder %s1405_s26, %s1143_s27  ;;  %s1148_s5 = sshll.u32 %s1267_s28, 4  ;;  %s1149_s5 = int_to_ptr.vmem [resolvable:$false] %s1148_s5 }
  0x41   : > { %s1150_s6 = scalar_lea.vmem %s1149_s5, 512  ;;  %p1151_p3 = scmp.lt.s32.totalorder %s1405_s26, %s1149_s5 }
  0x42   : > { %p1146_p10 = pnand %p1144_p8, %p1130_p0  ;;  %p1152_p7 = scmp.lt.s32.totalorder %s1150_s6, %s1143_s27 }
  0x44   : > { %p1147_p13 = pneg %p1146_p10  ;;  %p1153_p9 = por %p1152_p7, %p1151_p3 }
  0x46   : > { %p1154_p2 = pnand %p1153_p9, %p1147_p13 }
  0x48   : > { %1157 = shalt.err (!%p1154_p2)
}
  0x49   : > { %927 = dma.hbm_to_vmem [thread:$0]  (!%p1401_p11), %s1398_s22, 256, %s1405_s26, %s153_s8  }
  0x4a   : > { %s171_s9 = sand.u32 1, %s1262_s15   ;;  %s175_s10 = scalar_lea.vmem [#allocation5], %s1393_s29 }
  0x4b   : > { %s183_s11 = sshll.u32 %s175_s10, 4  ;;  %s172_s23 = scalar_lea.sflag [#allocation6], %s171_s9  ;;  %s184_s11 = int_to_ptr.vmem [resolvable:$true] %s183_s11 }
  0x4c   : > { %s1158_s30 = scalar_lea.hbm %s1410_s7, 256  ;;  %s1163_s28 = scalar_lea.hbm %s1796_s1, 512 }
  0x4d   : > { %p1159_p5 = scmp.ne.s32.totalorder %s1410_s7, %s1158_s30  ;;  %p1164_p6 = scmp.lt.u32.totalorder %s1410_s7, %s1796_s1 }
  0x4e   : > { %p1165_p8 = scmp.lt.u32.totalorder %s1163_s28, %s1158_s30  ;;  %p1167_p13 = scmp.lt.u32.totalorder %s1158_s30, %s1410_s7 }
  0x4f   : > { %p1161_p1 = pnand %p1159_p5, %p1130_p0 }
  0x50   : > { %p1166_p10 = por %p1165_p8, %p1164_p6 }
  0x51   : > { %p1162_p4 = pneg %p1161_p1 }
  0x52   : > { %p1168_p3 = por %p1167_p13, %p1166_p10 }
  0x54   : > { %p1169_p7 = pnand %p1168_p3, %p1162_p4 }
  0x56   : > { %1172 = shalt.err (!%p1169_p7)
}
  0x57   : > { %s1173_s29 = scalar_lea.vmem %s184_s11, 256  ;;  %s1268_s22 = smov [#allocation5]  }
  0x58   : > { %p1174_p9 = scmp.ne.s32.totalorder %s184_s11, %s1173_s29  ;;  %s1178_s26 = sshll.u32 %s1268_s22, 4  ;;  %s1179_s26 = int_to_ptr.vmem [resolvable:$false] %s1178_s26 }
  0x59   : > { %s1180_s8 = scalar_lea.vmem %s1179_s26, 512  ;;  %p1181_p1 = scmp.lt.s32.totalorder %s184_s11, %s1179_s26 }
  0x5a   : > { %p1176_p2 = pnand %p1174_p9, %p1130_p0  ;;  %p1182_p12 = scmp.lt.s32.totalorder %s1180_s8, %s1173_s29 }
  0x5c   : > { %p1177_p5 = pneg %p1176_p2  ;;  %p1183_p6 = por %p1182_p12, %p1181_p1 }
  0x5e   : > { %p1184_p8 = pnand %p1183_p6, %p1177_p5 }
  0x60   : > { %1187 = shalt.err (!%p1184_p8)
}
  0x61   : > { %930 = dma.hbm_to_vmem [thread:$0]  (!%p1401_p11), %s1410_s7, 256, %s184_s11, %s172_s23  }
  0x62   : > { %p1810_p4 = scmp.ne.s32.totalorder %s1805_s20, 0 }
  0x63   : > { %s1461_s9 = sand.u32 (!%p1810_p4), 1, %s1254_s13   ;;  %p1811_p12 = scmp.ne.s32.totalorder (!%p1810_p4), %s1803_s18, 0 }
  0x64   : > { %192 = sbr.rel (%p1810_p4) target bundleno = 1573 (0x625), region = 32  ;;  %s1464_s10 = sshll.u32 (!%p1810_p4), %s1461_s9, 4 }
  0x65   : > { %s195_s30 = scalar_lea.sflag (!%p1810_p4), [#allocation3], %s1461_s9  ;;  %s198_s25 = scalar_lea.vmem (!%p1810_p4), [#allocation2], %s1464_s10 }
  0x6b   : > { %1233 = dma.done.wait (%p1811_p12), %s195_s30, 256  }
  0x6c   : > { %1235 = vsyncadd (%p1811_p12), %s195_s30, 4294967040  ;;  %s203_s20 = sand.u32 1, %s1317_s16   ;;  %s207_s7 = scalar_lea.vmem [#allocation5], %s1464_s10 }
  0x6d   : > { %s204_s4 = scalar_lea.sflag [#allocation6], %s203_s20 }
  0x6e   : > { %1237 = dma.done.wait (%p1811_p12), %s204_s4, 256  }
  0x6f   : > { %1239 = vsyncadd (%p1811_p12), %s204_s4, 4294967040  ;;  %p1812_p11 = scmp.eq.s32.totalorder %s1317_s16, 0 }
  0x71   : > { %1241 = dma.done.wait (%p1812_p11), [#allocation6], 384   ;;  %p1813_p0 = pmov %p1812_p11 }
  0x72   : > { %v1482_v0 = vld [vmem:[%s198_s25] sm:$0xff]  ;;  %v1484_v1 = vld [vmem:[%s198_s25 + $0x8] sm:$0xff]  ;;  %s1269_s11 = smov 1   ;;  %s1270_s23 = smov 112   ;;  %v239_v3 = vlaneseq  ;;  %v1273_v28 = vmov 0.0   ;;  %vm344_vm9 = vcmask 654336  }
  0x73   : > { %1243 = vsyncadd (%p1813_p0), [#allocation6], 4294966912  ;;  %v980_v2 = vpack.i.bf16 %v1484_v1, %v1482_v0  ;;  %s1271_s18 = smov 127   ;;  %s1272_s27 = smov 16   ;;  %412 = vmatprep.mubr.f32.mxu0 %v1273_v28  ;;  %554 = vmatprep.mubr.f32.mxu1 %v1273_v28 }
  0x74   : > { %v1492_v4 = vand.u32 127, %v239_v3  ;;  %s849_s28 = sshll.u32 %s1317_s16, 8  ;;  %s238_s5 = scalar_lea.vmem [#allocation8], %s1464_s10 }
  0x75   : > { %981 = vrot.lane.b32.xlu0 %v980_v2, %s1269_s11  ;;  %996 = vrot.lane.b32.xlu1 %v980_v2, %s1270_s23  ;;  %s722_s6 = sshll.u32 %s238_s5, 4  ;;  %s1751_s26 = scalar_lea.hbm %s1798_s3, %s849_s28  ;;  %s1753_s6 = int_to_ptr.vmem [resolvable:$true] %s722_s6 }
  0x76   : > { %v1495_v5 = vadd.s32 128, %v1492_v4  ;;  %v246_v7 = vand.u32 15, %v1492_v4  ;;  %vm281_vm0 = vcmp.lt.s32.totalorder %v1492_v4, 1  ;;  %vm288_vm1 = vcmp.lt.s32.totalorder %v1492_v4, 127  ;;  %s708_s8 = scalar_lea.sflag [#allocation4], %s1461_s9  ;;  %s1188_s16 = scalar_lea.vmem %s1753_s6, 256 }
  0x77   : > { %vm270_vm6 = vcmp.lt.s32.totalorder %v1492_v4, 16  ;;  %vm305_vm7 = vcmp.lt.s32.totalorder %v1492_v4, 112  ;;  %p1189_p10 = scmp.ne.s32.totalorder %s1753_s6, %s1188_s16  ;;  %p1822_p13 = scmp.ne.s32.totalorder %s1808_s21, 0 }
  0x78   : > { %v253_v8 = vand.u32 15, %v1495_v5  ;;  %vm1501_vm2 = vcmp.eq.s32.totalorder %v246_v7, 15  ;;  %vm1505_vm3 = vcmp.eq.s32.totalorder %v246_v7, 0  ;;  %vm273_vm8 = vcmp.ge.s32.totalorder %v1495_v5, 240  ;;  %s1275_s10 = smov [#allocation8]  }
  0x79   : > { %986 = vrot.lane.b32.xlu0 %v980_v2, %s1271_s18  ;;  %p1190_p3 = pnand %p1189_p10, %p1822_p13  ;;  %s1192_s30 = sshll.u32 %s1275_s10, 4  ;;  %s1193_s30 = int_to_ptr.vmem [resolvable:$false] %s1192_s30 }
  0x7a   : > { %vm1509_vm4 = vcmp.eq.s32.totalorder %v253_v8, 15  ;;  %vm1513_vm5 = vcmp.eq.s32.totalorder %v253_v8, 0  ;;  %s1194_s25 = scalar_lea.vmem %s1193_s30, 512  ;;  %p1195_p9 = scmp.lt.s32.totalorder %s1753_s6, %s1193_s30 }
  0x7b   : > { %p1191_p7 = pneg %p1190_p3  ;;  %p1196_p2 = scmp.lt.s32.totalorder %s1194_s25, %s1188_s16 }
  0x7d   : > { %991 = vrot.lane.b32.xlu0 %v980_v2, %s1272_s27  ;;  %p1197_p5 = por %p1196_p2, %p1195_p9 }
  0x7f   : > { %p1198_p1 = pnand %p1197_p5, %p1191_p7 }
  0xe7   : > { %v982_v6 = vpop.permute.xlu0 %981  ;;  %v997_v29 = vpop.permute.xlu1 %996 }
  0xe8   : > { %v984_v9 = vunpack.i.h.bf16 %v982_v6  ;;  %v983_v10 = vunpack.i.l.bf16 %v982_v6  ;;  %v999_v35 = vunpack.i.h.bf16 %v997_v29  ;;  %v998_v36 = vunpack.i.l.bf16 %v997_v29 }
  0xea   : > { %v282_v18 = vsel %vm281_vm0, %v983_v10, %v984_v9  ;;  %v283_v19 = vsel %vm281_vm0, %v984_v9, %v983_v10  ;;  %v322_v48 = vsel %vm305_vm7, %v998_v36, %v999_v35  ;;  %v323_v2 = vsel %vm305_vm7, %v999_v35, %v998_v36 }
  0xeb   : > { %v987_v11 = vpop.permute.xlu0 %986 }
  0xec   : > { %v989_v14 = vunpack.i.h.bf16 %v987_v11  ;;  %v988_v15 = vunpack.i.l.bf16 %v987_v11 }
  0xee   : > { %v289_v20 = vsel %vm288_vm1, %v988_v15, %v989_v14  ;;  %v290_v21 = vsel %vm288_vm1, %v989_v14, %v988_v15  ;;  %v1274_v14 = vmov 1.0  }
  0xef   : > { %v1527_v22 = vsel %vm1501_vm2, %v283_v19, %v289_v20  ;;  %v294_v23 = vsel %vm1509_vm4, %v282_v18, %v290_v21  ;;  %v291_v24 = vsel %vm1505_vm3, %v289_v20, %v283_v19  ;;  %v292_v25 = vsel %vm1513_vm5, %v290_v21, %v282_v18  ;;  %v992_v30 = vpop.permute.xlu0 %991  ;;  %v276_v19 = vld [vmem:[#allocation7] sm:$0xff] }
  0xf0   : > { %v1010_v26 = vpack.i.bf16 %v294_v23, %v1527_v22  ;;  %v1000_v27 = vpack.i.bf16 %v292_v25, %v291_v24  ;;  %v994_v31 = vunpack.i.h.bf16 %v992_v30  ;;  %v993_v32 = vunpack.i.l.bf16 %v992_v30 }
  0xf1   : > { %v858_v3 = vpack.c.bf16 %v294_v23, %v1484_v1  ;;  %v860_v9 = vpack.c.bf16 %v1527_v22, %v1482_v0 }
  0xf2   : > { %1011 = vrot.lane.b32.xlu0 %v1010_v26, %s1272_s27  ;;  %1001 = vrot.lane.b32.xlu1 %v1000_v27, %s1272_s27  ;;  %v316_v42 = vsel %vm270_vm6, %v993_v32, %v994_v31  ;;  %v317_v47 = vsel %vm270_vm6, %v994_v31, %v993_v32 }
  0xf3   : > { %v324_v54 = vsel %vm270_vm6, %v322_v48, %v317_v47  ;;  %v327_v8 = vsel %vm273_vm8, %v316_v42, %v323_v2 }
  0xf6   : > { %1006 = vrot.lane.b32.xlu1 %v1000_v27, %s1270_s23 }
  0xfa   : > { %1016 = vrot.lane.b32.xlu1 %v1010_v26, %s1270_s23 }
 0x164   : > { %v1012_v33 = vpop.permute.xlu0 %1011  ;;  %v1002_v34 = vpop.permute.xlu1 %1001 }
 0x165   : > { %v1004_v37 = vunpack.i.h.bf16 %v1002_v34  ;;  %v1003_v38 = vunpack.i.l.bf16 %v1002_v34  ;;  %v1014_v39 = vunpack.i.h.bf16 %v1012_v33  ;;  %v1013_v40 = vunpack.i.l.bf16 %v1012_v33 }
 0x167   : > { %v299_v41 = vsel %vm270_vm6, %v1003_v38, %v1004_v37  ;;  %v300_v49 = vsel %vm270_vm6, %v1004_v37, %v1003_v38  ;;  %v332_v51 = vsel %vm270_vm6, %v1013_v40, %v1014_v39  ;;  %v333_v59 = vsel %vm270_vm6, %v1014_v39, %v1013_v40 }
 0x168   : > { %v1007_v43 = vpop.permute.xlu1 %1006  ;;  %v850_v44 = vpack.c.bf16 %v316_v42, %v299_v41  ;;  %v854_v58 = vpack.c.bf16 %v292_v25, %v332_v51 }
 0x169   : > { %v1009_v45 = vunpack.i.h.bf16 %v1007_v43  ;;  %v1008_v46 = vunpack.i.l.bf16 %v1007_v43 }
 0x16a   : > { %851 = vmatprep.subr.bf16.mxu0 %v850_v44 }
 0x16b   : > { %v306_v50 = vsel %vm305_vm7, %v1008_v46, %v1009_v45  ;;  %v307_v61 = vsel %vm305_vm7, %v1009_v45, %v1008_v46 }
 0x16c   : > { %v1017_v52 = vpop.permute.xlu1 %1016  ;;  %v308_v53 = vsel %vm270_vm6, %v306_v50, %v300_v49  ;;  %v311_v6 = vsel %vm273_vm8, %v299_v41, %v307_v61  ;;  %v864_v1 = vpack.c.bf16 %v322_v48, %v306_v50 }
 0x16d   : > { %v1019_v55 = vunpack.i.h.bf16 %v1017_v52  ;;  %v1018_v56 = vunpack.i.l.bf16 %v1017_v52  ;;  %v852_v57 = vpack.c.bf16 %v324_v54, %v308_v53  ;;  %v862_v10 = vpack.c.bf16 %v327_v8, %v311_v6 }
 0x16f   : > { %v338_v60 = vsel %vm305_vm7, %v1018_v56, %v1019_v55  ;;  %853 = vmatpush1.bf16.msra.mxu0 %v852_v57  ;;  %v339_v7 = vsel %vm305_vm7, %v1019_v55, %v1018_v56 }
 0x170   : > { %855 = vmatprep.subr.bf16.mxu0 %v854_v58  ;;  %v340_v62 = vsel %vm270_vm6, %v338_v60, %v333_v59  ;;  %v343_v11 = vsel %vm273_vm8, %v332_v51, %v339_v7  ;;  %v868_v18 = vpack.c.bf16 %v1274_v14, %v338_v60 }
 0x171   : > { %v856_v63 = vpack.c.bf16 %v291_v24, %v340_v62  ;;  %v866_v15 = vpack.c.bf16 %v1274_v14, %v343_v11 }
 0x173   : > { %857 = vmatpush1.bf16.msra.mxu0 %v856_v63 }
 0x174   : > { %859 = vmatprep.subr.bf16.mxu0 %v858_v3 }
 0x177   : > { %861 = vmatpush1.bf16.msra.mxu0 %v860_v9 }
 0x178   : > { %863 = vmatprep.subr.bf16.mxu0 %v862_v10 }
 0x17b   : > { %865 = vmatpush1.bf16.msra.mxu0 %v864_v1 }
 0x17c   : > { %867 = vmatprep.subr.bf16.mxu0 %v866_v15 }
 0x17f   : > { %869 = vmatpush1.bf16.msra.mxu0 %v868_v18 }
 0x182   : > { %839 = vmatmul.mubr.msk.f32.vlgmr.msra.gmra.mrb[0].mxu0 %vm344_vm9, %v276_v19 }
 0x183   : > { %698 = vmatprep.mubr.f32.mxu0 %v1273_v28 }
 0x255   : > { %v1588_v0 = vpop.f32.mrb[0].mxu0 }
 0x256   : > { %v419_v20 = vmax.f32 %v1588_v0, 0.0  ;;  %v1591_v21 = vpop.f32.mrb[1].mxu0 }
 0x257   : > { %v420_v22 = vmax.f32 %v1591_v21, 0.0 }
 0x259   : > { %v1025_v23 = vpack.i.bf16 %v420_v22, %v419_v20 }
 0x25b   : > { %1026 = vrot.lane.b32.xlu1 %v1025_v23, %s1271_s18  ;;  %1021 = vrot.lane.b32.xlu0 %v1025_v23, %s1269_s11 }
 0x25f   : > { %1036 = vrot.lane.b32.xlu1 %v1025_v23, %s1270_s23  ;;  %1031 = vrot.lane.b32.xlu0 %v1025_v23, %s1272_s27 }
 0x2cd   : > { %v1027_v24 = vpop.permute.xlu1 %1026  ;;  %v1022_v25 = vpop.permute.xlu0 %1021 }
 0x2ce   : > { %v1029_v26 = vunpack.i.h.bf16 %v1027_v24  ;;  %v1028_v27 = vunpack.i.l.bf16 %v1027_v24  ;;  %v1024_v28 = vunpack.i.h.bf16 %v1022_v25  ;;  %v1023_v29 = vunpack.i.l.bf16 %v1022_v25 }
 0x2d0   : > { %v433_v30 = vsel %vm288_vm1, %v1028_v27, %v1029_v26  ;;  %v434_v31 = vsel %vm288_vm1, %v1029_v26, %v1028_v27  ;;  %v427_v32 = vsel %vm281_vm0, %v1023_v29, %v1024_v28  ;;  %v428_v33 = vsel %vm281_vm0, %v1024_v28, %v1023_v29 }
 0x2d1   : > { %v435_v34 = vsel %vm1505_vm3, %v433_v30, %v428_v33  ;;  %v436_v35 = vsel %vm1513_vm5, %v434_v31, %v427_v32  ;;  %v437_v37 = vsel %vm1501_vm2, %v428_v33, %v433_v30  ;;  %v438_v38 = vsel %vm1509_vm4, %v427_v32, %v434_v31  ;;  %v1037_v40 = vpop.permute.xlu1 %1036  ;;  %v1032_v41 = vpop.permute.xlu0 %1031  ;;  %v422_v31 = vld [vmem:[#allocation7 + $0x8] sm:$0xff] }
 0x2d2   : > { %v1045_v36 = vpack.i.bf16 %v436_v35, %v435_v34  ;;  %v1055_v39 = vpack.i.bf16 %v438_v38, %v437_v37  ;;  %v1039_v42 = vunpack.i.h.bf16 %v1037_v40  ;;  %v1038_v43 = vunpack.i.l.bf16 %v1037_v40 }
 0x2d3   : > { %v1034_v44 = vunpack.i.h.bf16 %v1032_v41  ;;  %v1033_v45 = vunpack.i.l.bf16 %v1032_v41  ;;  %v878_v23 = vpack.c.bf16 %v438_v38, %v420_v22  ;;  %v880_v27 = vpack.c.bf16 %v437_v37, %v419_v20 }
 0x2d4   : > { %1046 = vrot.lane.b32.xlu1 %v1045_v36, %s1270_s23  ;;  %1041 = vrot.lane.b32.xlu0 %v1045_v36, %s1272_s27  ;;  %v465_v49 = vsel %vm305_vm7, %v1038_v43, %v1039_v42  ;;  %v466_v19 = vsel %vm305_vm7, %v1039_v42, %v1038_v43 }
 0x2d5   : > { %v460_v48 = vsel %vm270_vm6, %v1034_v44, %v1033_v45  ;;  %v459_v55 = vsel %vm270_vm6, %v1033_v45, %v1034_v44 }
 0x2d6   : > { %v467_v62 = vsel %vm270_vm6, %v465_v49, %v460_v48  ;;  %v470_v26 = vsel %vm273_vm8, %v459_v55, %v466_v19 }
 0x2d8   : > { %1056 = vrot.lane.b32.xlu1 %v1055_v39, %s1270_s23  ;;  %1051 = vrot.lane.b32.xlu0 %v1055_v39, %s1272_s27 }
 0x346   : > { %v1047_v46 = vpop.permute.xlu1 %1046  ;;  %v1042_v47 = vpop.permute.xlu0 %1041 }
 0x347   : > { %v1049_v50 = vunpack.i.h.bf16 %v1047_v46  ;;  %v1048_v51 = vunpack.i.l.bf16 %v1047_v46  ;;  %v1044_v52 = vunpack.i.h.bf16 %v1042_v47  ;;  %v1043_v53 = vunpack.i.l.bf16 %v1042_v47 }
 0x349   : > { %v443_v54 = vsel %vm270_vm6, %v1043_v53, %v1044_v52  ;;  %v444_v56 = vsel %vm270_vm6, %v1044_v52, %v1043_v53  ;;  %v449_v57 = vsel %vm305_vm7, %v1048_v51, %v1049_v50  ;;  %v450_v15 = vsel %vm305_vm7, %v1049_v50, %v1048_v51 }
 0x34a   : > { %v1057_v58 = vpop.permute.xlu1 %1056  ;;  %v1052_v59 = vpop.permute.xlu0 %1051  ;;  %v870_v60 = vpack.c.bf16 %v459_v55, %v443_v54  ;;  %v451_v61 = vsel %vm270_vm6, %v449_v57, %v444_v56  ;;  %v454_v24 = vsel %vm273_vm8, %v443_v54, %v450_v15  ;;  %v884_v22 = vpack.c.bf16 %v465_v49, %v449_v57 }
 0x34b   : > { %v1059_v63 = vunpack.i.h.bf16 %v1057_v58  ;;  %v1058_v2 = vunpack.i.l.bf16 %v1057_v58  ;;  %v1054_v3 = vunpack.i.h.bf16 %v1052_v59  ;;  %v1053_v6 = vunpack.i.l.bf16 %v1052_v59 }
 0x34c   : > { %871 = vmatprep.subr.bf16.mxu1 %v870_v60  ;;  %v872_v7 = vpack.c.bf16 %v467_v62, %v451_v61  ;;  %v882_v28 = vpack.c.bf16 %v470_v26, %v454_v24 }
 0x34d   : > { %v481_v8 = vsel %vm305_vm7, %v1058_v2, %v1059_v63  ;;  %v476_v9 = vsel %vm270_vm6, %v1054_v3, %v1053_v6  ;;  %v475_v10 = vsel %vm270_vm6, %v1053_v6, %v1054_v3  ;;  %v482_v25 = vsel %vm305_vm7, %v1059_v63, %v1058_v2 }
 0x34e   : > { %873 = vmatpush1.bf16.msra.mxu1 %v872_v7  ;;  %v874_v11 = vpack.c.bf16 %v436_v35, %v475_v10  ;;  %v483_v1 = vsel %vm270_vm6, %v481_v8, %v476_v9  ;;  %v486_v21 = vsel %vm273_vm8, %v475_v10, %v482_v25  ;;  %v888_v30 = vpack.c.bf16 %v1274_v14, %v481_v8 }
 0x34f   : > { %v876_v18 = vpack.c.bf16 %v435_v34, %v483_v1  ;;  %v886_v29 = vpack.c.bf16 %v1274_v14, %v486_v21 }
 0x350   : > { %875 = vmatprep.subr.bf16.mxu1 %v874_v11 }
 0x352   : > { %877 = vmatpush1.bf16.msra.mxu1 %v876_v18 }
 0x353   : > { %879 = vmatprep.subr.bf16.mxu1 %v878_v23 }
 0x356   : > { %881 = vmatpush1.bf16.msra.mxu1 %v880_v27 }
 0x357   : > { %883 = vmatprep.subr.bf16.mxu1 %v882_v28 }
 0x35a   : > { %885 = vmatpush1.bf16.msra.mxu1 %v884_v22 }
 0x35b   : > { %887 = vmatprep.subr.bf16.mxu1 %v886_v29 }
 0x35e   : > { %889 = vmatpush1.bf16.msra.mxu1 %v888_v30 }
 0x361   : > { %840 = vmatmul.mubr.msk.f32.vlgmr.msra.gmra.mrb[0].mxu1 %vm344_vm9, %v422_v31 }
 0x434   : > { %v1665_v32 = vpop.f32.mrb[0].mxu1 }
 0x435   : > { %v561_v0 = vmax.f32 %v1665_v32, 0.0  ;;  %v1668_v20 = vpop.f32.mrb[1].mxu1 }
 0x436   : > { %v562_v33 = vmax.f32 %v1668_v20, 0.0 }
 0x438   : > { %v1065_v34 = vpack.i.bf16 %v562_v33, %v561_v0 }
 0x43a   : > { %1066 = vrot.lane.b32.xlu1 %v1065_v34, %s1271_s18  ;;  %1061 = vrot.lane.b32.xlu0 %v1065_v34, %s1269_s11 }
 0x43e   : > { %1076 = vrot.lane.b32.xlu1 %v1065_v34, %s1270_s23  ;;  %1071 = vrot.lane.b32.xlu0 %v1065_v34, %s1272_s27 }
 0x4ac   : > { %v1067_v35 = vpop.permute.xlu1 %1066  ;;  %v1062_v36 = vpop.permute.xlu0 %1061 }
 0x4ad   : > { %v1069_v37 = vunpack.i.h.bf16 %v1067_v35  ;;  %v1068_v38 = vunpack.i.l.bf16 %v1067_v35  ;;  %v1064_v39 = vunpack.i.h.bf16 %v1062_v36  ;;  %v1063_v40 = vunpack.i.l.bf16 %v1062_v36  ;;  %v629_v36 = vld [vmem:[%s207_s7] sm:$0xff] }
 0x4af   : > { %v575_v41 = vsel %vm288_vm1, %v1068_v38, %v1069_v37  ;;  %v576_v42 = vsel %vm288_vm1, %v1069_v37, %v1068_v38  ;;  %v569_v43 = vsel %vm281_vm0, %v1063_v40, %v1064_v39  ;;  %v570_v44 = vsel %vm281_vm0, %v1064_v39, %v1063_v40  ;;  %v630_v37 = vld [vmem:[%s207_s7 + $0x8] sm:$0xff] }
 0x4b0   : > { %v577_v45 = vsel %vm1505_vm3, %v575_v41, %v570_v44  ;;  %v578_v46 = vsel %vm1513_vm5, %v576_v42, %v569_v43  ;;  %v579_v48 = vsel %vm1501_vm2, %v570_v44, %v575_v41  ;;  %v580_v49 = vsel %vm1509_vm4, %v569_v43, %v576_v42  ;;  %v1077_v13 = vpop.permute.xlu1 %1076  ;;  %v1072_v51 = vpop.permute.xlu0 %1071 }
 0x4b1   : > { %v1085_v47 = vpack.i.bf16 %v578_v46, %v577_v45  ;;  %v1095_v50 = vpack.i.bf16 %v580_v49, %v579_v48  ;;  %v1079_v17 = vunpack.i.h.bf16 %v1077_v13  ;;  %v1078_v52 = vunpack.i.l.bf16 %v1077_v13 }
 0x4b2   : > { %v1074_v53 = vunpack.i.h.bf16 %v1072_v51  ;;  %v1073_v54 = vunpack.i.l.bf16 %v1072_v51  ;;  %v898_v22 = vpack.c.bf16 %v580_v49, %v562_v33  ;;  %v900_v31 = vpack.c.bf16 %v579_v48, %v561_v0  ;;  %v564_v0 = vld [vmem:[#allocation7 + $0x10] sm:$0xff] }
 0x4b3   : > { %1086 = vrot.lane.b32.xlu1 %v1085_v47, %s1270_s23  ;;  %1081 = vrot.lane.b32.xlu0 %v1085_v47, %s1272_s27  ;;  %v607_v12 = vsel %vm305_vm7, %v1078_v52, %v1079_v17  ;;  %v608_v21 = vsel %vm305_vm7, %v1079_v17, %v1078_v52 }
 0x4b4   : > { %v602_v16 = vsel %vm270_vm6, %v1074_v53, %v1073_v54  ;;  %v601_v2 = vsel %vm270_vm6, %v1073_v54, %v1074_v53 }
 0x4b5   : > { %v609_v9 = vsel %vm270_vm6, %v607_v12, %v602_v16  ;;  %v612_v34 = vsel %vm273_vm8, %v601_v2, %v608_v21 }
 0x4b7   : > { %1096 = vrot.lane.b32.xlu1 %v1095_v50, %s1270_s23  ;;  %1091 = vrot.lane.b32.xlu0 %v1095_v50, %s1272_s27 }
 0x525   : > { %v1087_v55 = vpop.permute.xlu1 %1086  ;;  %v1082_v56 = vpop.permute.xlu0 %1081 }
 0x526   : > { %v1089_v57 = vunpack.i.h.bf16 %v1087_v55  ;;  %v1088_v58 = vunpack.i.l.bf16 %v1087_v55  ;;  %v1084_v59 = vunpack.i.h.bf16 %v1082_v56  ;;  %v1083_v60 = vunpack.i.l.bf16 %v1082_v56 }
 0x528   : > { %v591_v61 = vsel %vm305_vm7, %v1088_v58, %v1089_v57  ;;  %v586_v62 = vsel %vm270_vm6, %v1084_v59, %v1083_v60  ;;  %v585_v63 = vsel %vm270_vm6, %v1083_v60, %v1084_v59  ;;  %v592_v27 = vsel %vm305_vm7, %v1089_v57, %v1088_v58 }
 0x529   : > { %v1097_v3 = vpop.permute.xlu1 %1096  ;;  %v1092_v6 = vpop.permute.xlu0 %1091  ;;  %v890_v7 = vpack.c.bf16 %v601_v2, %v585_v63  ;;  %v593_v8 = vsel %vm270_vm6, %v591_v61, %v586_v62  ;;  %v596_v29 = vsel %vm273_vm8, %v585_v63, %v592_v27  ;;  %v904_v35 = vpack.c.bf16 %v607_v12, %v591_v61 }
 0x52a   : > { %v1099_v10 = vunpack.i.h.bf16 %v1097_v3  ;;  %v1098_v11 = vunpack.i.l.bf16 %v1097_v3  ;;  %v1094_v1 = vunpack.i.h.bf16 %v1092_v6  ;;  %v1093_v15 = vunpack.i.l.bf16 %v1092_v6 }
 0x52b   : > { %891 = vmatprep.subr.bf16.mxu0 %v890_v7  ;;  %v892_v18 = vpack.c.bf16 %v609_v9, %v593_v8  ;;  %v902_v20 = vpack.c.bf16 %v612_v34, %v596_v29 }
 0x52c   : > { %v623_v19 = vsel %vm305_vm7, %v1098_v11, %v1099_v10  ;;  %v618_v23 = vsel %vm270_vm6, %v1094_v1, %v1093_v15  ;;  %v617_v24 = vsel %vm270_vm6, %v1093_v15, %v1094_v1  ;;  %v624_v30 = vsel %vm305_vm7, %v1099_v10, %v1098_v11 }
 0x52d   : > { %v625_v25 = vsel %vm270_vm6, %v623_v19, %v618_v23  ;;  %893 = vmatpush1.bf16.msra.mxu0 %v892_v18  ;;  %v894_v26 = vpack.c.bf16 %v578_v46, %v617_v24  ;;  %v628_v33 = vsel %vm273_vm8, %v617_v24, %v624_v30  ;;  %v908_v32 = vpack.c.bf16 %v1274_v14, %v623_v19 }
 0x52e   : > { %v896_v28 = vpack.c.bf16 %v577_v45, %v625_v25  ;;  %v906_v4 = vpack.c.bf16 %v1274_v14, %v628_v33 }
 0x52f   : > { %895 = vmatprep.subr.bf16.mxu0 %v894_v26 }
 0x531   : > { %897 = vmatpush1.bf16.msra.mxu0 %v896_v28 }
 0x532   : > { %899 = vmatprep.subr.bf16.mxu0 %v898_v22 }
 0x535   : > { %901 = vmatpush1.bf16.msra.mxu0 %v900_v31 }
 0x536   : > { %903 = vmatprep.subr.bf16.mxu0 %v902_v20 }
 0x539   : > { %905 = vmatpush1.bf16.msra.mxu0 %v904_v35 }
 0x53a   : > { %907 = vmatprep.subr.bf16.mxu0 %v906_v4 }
 0x53d   : > { %909 = vmatpush1.bf16.msra.mxu0 %v908_v32 }
 0x540   : > { %841 = vmatmul.mubr.msk.f32.vlgmr.msra.gmra.mrb[2].mxu0 %vm344_vm9, %v564_v0 }
 0x613   : > { %v700_v5 = vpop.f32.mrb[2].mxu0 }
 0x614   : > { %v701_v38 = vadd.f32 %v700_v5, %v629_v36  ;;  %v702_v39 = vpop.f32.mrb[3].mxu0 }
 0x615   : > { %v703_v40 = vadd.f32 %v702_v39, %v630_v37 }
 0x616   : > { %705 = vst [vmem:[%s238_s5] sm:$0xff] %v701_v38 }
 0x617   : > { %706 = vst [vmem:[%s238_s5 + $0x8] sm:$0xff] %v703_v40 }
 0x618   : > { %1201 = shalt.err (!%p1198_p1)
}
 0x619   : > { %s1202_s9 = scalar_lea.hbm %s1751_s26, 256  ;;  %s1206_s7 = scalar_lea.hbm %s1798_s3, 512 }
 0x61a   : > { %p1203_p6 = scmp.ne.s32.totalorder %s1751_s26, %s1202_s9  ;;  %p1207_p12 = scmp.lt.u32.totalorder %s1751_s26, %s1798_s3 }
 0x61b   : > { %p1208_p11 = scmp.lt.u32.totalorder %s1206_s7, %s1202_s9  ;;  %p1210_p10 = scmp.lt.u32.totalorder %s1202_s9, %s1751_s26 }
 0x61c   : > { %p1204_p8 = pnand %p1203_p6, %p1822_p13 }
 0x61d   : > { %p1209_p0 = por %p1208_p11, %p1207_p12 }
 0x61e   : > { %p1205_p4 = pneg %p1204_p8 }
 0x61f   : > { %p1211_p3 = por %p1210_p10, %p1209_p0 }
 0x621   : > { %p1212_p7 = pnand %p1211_p3, %p1205_p4 }
 0x623   : > { %1215 = shalt.err (!%p1212_p7)
}
 0x624   : > { %918 = dma.vmem_to_hbm [thread:$0]  (%p1822_p13), %s1753_s6, 256, %s1751_s26, %s708_s8  }
 0x625 PF: > { %s734_s18 = sand.u32 1, %s1250_s12   ;;  %p1823_p9 = scmp.ne.s32.totalorder %s1804_s19, 0 }
 0x626   : > { %p1824_p2 = scmp.ge.s32.totalorder %s1262_s15, 2  ;;  %s735_s27 = scalar_lea.sflag [#allocation4], %s734_s18 }
 0x628   : > { %p932_p5 = pnand %p1824_p2, %p1823_p9 }
 0x62a   : > { %1245 = dma.done.wait (!%p932_p5), %s735_s27, 256  }
 0x62b   : > { %1247 = vsyncadd (!%p932_p5), %s735_s27, 4294967040  ;;  %p19_p1 = scmp.ge.s32.totalorder %s1352_s24, 4   ;;  %s1825_s12 = smov %s1254_s13 }
 0x62c   : > { %s1826_s13 = smov %s1258_s14  ;;  %s1827_s14 = smov %s1383_s17 }
 0x62d   : > { %s1828_s15 = smov %s1352_s24  ;;  %21 = sbr.rel (!%p19_p1) target bundleno = 7 (0x7), region = 96 }
 0x634   :  { %740 = vsyncpa [#allocation3], 1 }
 0x635   :  { %742 = vsyncpa [#allocation3 + $0x1], 1 }
 0x636   :  { %743 = vsyncpa [#allocation6], 1 }
 0x637   :  { %745 = vsyncpa [#allocation6 + $0x1], 1 }
 0x638   :  { %746 = vsyncpa [#allocation4], 1 }
 0x639   :  { %748 = vsyncpa [#allocation4 + $0x1], 1 }

</bundles_post_ra>
